<compile_context>
chip_gen: v7x
topology: tpu7x:2x2x1
jax: 0.10.0
libtpu: 0.0.40
codegen_flags: <defaults>
</compile_context>

<pallas_src>
import functools

import jax
import jax.numpy as jnp
from jax.experimental import pallas as pl
from jax.experimental.pallas import tpu as pltpu


def _round_up(x, m):
    return pl.cdiv(x, m) * m


def _decoder_kernel(h_ref, w_ref, b_ref, mask_ref, recon_ref, *, d, dh):
    """Fused two-head linear decoder.

    acc = h @ W_fused + b_fused   (W_fused lanes: [0,dh)=mask head, [dh,2dh)=recon head)
    mask_ref  <- sigmoid(acc[:, :d])
    recon_ref <- acc[:, dh:dh+d]
    """
    acc = jnp.dot(h_ref[...], w_ref[...], preferred_element_type=jnp.float32)
    acc = acc + b_ref[...]                      # (1, 2*dh) f32 bias broadcast
    # Sigmoid only on the mask head's columns (EUP slot; recon passes through).
    mask_ref[...] = jax.nn.sigmoid(acc[:, :d]).astype(mask_ref.dtype)
    recon_ref[...] = acc[:, dh:dh + d].astype(recon_ref.dtype)


def pack_decoder_params(w_mask, b_mask, w_recon, b_recon, *, param_dtype=None):
    """One-time fusion of the two heads into a lane-aligned weight / bias.

    Weights are stored transposed relative to PyTorch nn.Linear, i.e. (R, D),
    so the kernel computes plain h @ W + b.  Call once at init (not per step).
    """
    r, d = w_mask.shape
    dh = max(128, _round_up(d, 128))            # lane-aligned head stride
    dp = 2 * dh
    if param_dtype is None:
        param_dtype = jnp.result_type(w_mask.dtype, w_recon.dtype)
    w_fused = jnp.zeros((r, dp), dtype=param_dtype)
    w_fused = w_fused.at[:, :d].set(w_mask.astype(param_dtype))
    w_fused = w_fused.at[:, dh:dh + d].set(w_recon.astype(param_dtype))
    b_fused = jnp.zeros((1, dp), dtype=jnp.float32)
    b_fused = b_fused.at[:, :d].set(b_mask.astype(jnp.float32).reshape(1, d))
    b_fused = b_fused.at[:, dh:dh + d].set(
        b_recon.astype(jnp.float32).reshape(1, d))
    return w_fused, b_fused, d


def decoder_forward(h, packed_params, *, tm=None, tm_max=4096):
    """mask = sigmoid(h @ Wm + bm), recon = h @ Wr + br  (fused Pallas kernel).

    packed_params: output of `pack_decoder_params` (fused weight/bias + d).
    tm: batch tile (rows per grid step).  Default (None) auto-picks a large
        tile (up to tm_max) while keeping the grid at >=2 steps so both
        TensorCores stay busy on v7x megacore.  The per-step footprint is only
        a few MiB even at tm=4096, so VMEM is not a constraint on any
        generation (including v7x's 64 MiB).
    """
    w_fused, b_fused, d = packed_params
    n, r = h.shape
    dp = w_fused.shape[1]
    dh = dp // 2

    itemsize = jnp.dtype(h.dtype).itemsize
    sub = max(8, 32 // itemsize)                # sublane packing: 8/16/32

    n_sub = max(sub, _round_up(n, sub))
    if tm is None:
        grid_n = max(1, pl.cdiv(n_sub, tm_max))
        if grid_n == 1 and n_sub >= 2 * sub:
            grid_n = 2                          # >=2 steps -> megacore sharding
        tm = _round_up(pl.cdiv(n_sub, grid_n), sub)
    else:
        tm = max(sub, _round_up(min(tm, n_sub), sub))
    grid_n = pl.cdiv(n_sub, tm)
    n_pad = grid_n * tm
    if n_pad != n:
        h = jnp.pad(h, ((0, n_pad - n), (0, 0)))

    cost = pl.CostEstimate(
        flops=2 * n_pad * r * dp,
        transcendentals=n_pad * d,              # sigmoid on mask head only
        bytes_accessed=(n_pad * r * itemsize                      # h
                        + r * dp * jnp.dtype(w_fused.dtype).itemsize  # weight
                        + dp * 4                                   # bias (f32)
                        + 2 * n_pad * d * itemsize),               # two outputs
    )

    mask, recon = pl.pallas_call(
        functools.partial(_decoder_kernel, d=d, dh=dh),
        out_shape=(jax.ShapeDtypeStruct((n_pad, d), h.dtype),
                   jax.ShapeDtypeStruct((n_pad, d), h.dtype)),
        grid=(grid_n,),
        in_specs=[
            pl.BlockSpec((tm, r), lambda i: (i, 0)),    # h tile (pipelined)
            pl.BlockSpec((r, dp), lambda i: (0, 0)),    # fused weight, resident
            pl.BlockSpec((1, dp), lambda i: (0, 0)),    # fused bias, resident
        ],
        out_specs=(pl.BlockSpec((tm, d), lambda i: (i, 0)),
                   pl.BlockSpec((tm, d), lambda i: (i, 0))),
        compiler_params=pltpu.CompilerParams(
            dimension_semantics=("parallel",),
        ),
        cost_estimate=cost,
    )(h, w_fused, b_fused)

    if n_pad != n:
        mask = mask[:n]
        recon = recon[:n]
    return mask, recon


def init_decoder_params(key, rep_dim, d, dtype=jnp.float32):
    """PyTorch-Linear-style init: U(-1/sqrt(fan_in), 1/sqrt(fan_in)).

    Weights are stored as (rep_dim, d) == PyTorch weight.T for direct h @ W.
    """
    k1, k2, k3, k4 = jax.random.split(key, 4)
    bound = 1.0 / (rep_dim ** 0.5)
    w_mask = jax.random.uniform(k1, (rep_dim, d), dtype, -bound, bound)
    b_mask = jax.random.uniform(k2, (1, d), dtype, -bound, bound)
    w_recon = jax.random.uniform(k3, (rep_dim, d), dtype, -bound, bound)
    b_recon = jax.random.uniform(k4, (1, d), dtype, -bound, bound)
    return w_mask, b_mask, w_recon, b_recon


def _reference(h, w_mask, b_mask, w_recon, b_recon):
    return jax.nn.sigmoid(h @ w_mask + b_mask), h @ w_recon + b_recon


if __name__ == "__main__":
    # Small shapes consistent with the module: batch=8, rep_dim=32, d=16.
    batch, rep_dim, d = 8, 32, 16

    key = jax.random.PRNGKey(0)
    k_h, k_p, k_h2, k_h3 = jax.random.split(key, 4)
    h = jax.random.normal(k_h, (batch, rep_dim), dtype=jnp.float32)
    w_mask, b_mask, w_recon, b_recon = init_decoder_params(k_p, rep_dim, d)
    packed = pack_decoder_params(w_mask, b_mask, w_recon, b_recon)

    mask_out, recon_out = decoder_forward(h, packed)
    jax.block_until_ready((mask_out, recon_out))

    mask_ref, recon_ref = _reference(h, w_mask, b_mask, w_recon, b_recon)
    assert mask_out.shape == (batch, d) and recon_out.shape == (batch, d)
    assert jnp.allclose(mask_out, mask_ref, atol=1e-5), "mask head mismatch"
    assert jnp.allclose(recon_out, recon_ref, atol=1e-5), "recon head mismatch"

    # Check 2: non-multiple batch with explicit tile -> row padding + multi-step grid.
    h2 = jax.random.normal(k_h2, (300, rep_dim), dtype=jnp.float32)
    m2, r2 = decoder_forward(h2, packed, tm=128)
    jax.block_until_ready((m2, r2))
    m2_ref, r2_ref = _reference(h2, w_mask, b_mask, w_recon, b_recon)
    assert m2.shape == (300, d) and r2.shape == (300, d)
    assert jnp.allclose(m2, m2_ref, atol=1e-5), "mask head mismatch (grid)"
    assert jnp.allclose(r2, r2_ref, atol=1e-5), "recon head mismatch (grid)"

    # Check 3: bf16 activations -> sublane-16 tile rounding + auto (>=2 step)
    # megacore-aware tiling; weights stay f32 (no silent downcast).
    h3 = jax.random.normal(k_h3, (272, rep_dim), dtype=jnp.float32).astype(jnp.bfloat16)
    m3, r3 = decoder_forward(h3, packed)
    jax.block_until_ready((m3, r3))
    m3_ref, r3_ref = _reference(h3.astype(jnp.float32), w_mask, b_mask, w_recon, b_recon)
    assert m3.shape == (272, d) and r3.shape == (272, d)
    assert jnp.allclose(m3.astype(jnp.float32), m3_ref, atol=3e-2), "mask mismatch (bf16)"
    assert jnp.allclose(r3.astype(jnp.float32), r3_ref, atol=3e-2), "recon mismatch (bf16)"

    print("KERNEL_OK")
</pallas_src>

<mosaic_0001>
module attributes {stable_mosaic.version = 11 : i64} {
  func.func @_decoder_kernel(%arg0: i32, %arg1: memref<8x32xf32, #tpu.memory_space<vmem>>, %arg2: memref<32x256xf32, #tpu.memory_space<vmem>>, %arg3: memref<1x256xf32, #tpu.memory_space<vmem>>, %arg4: memref<8x16xf32, #tpu.memory_space<vmem>>, %arg5: memref<8x16xf32, #tpu.memory_space<vmem>>) attributes {dimension_semantics = [#tpu.dimension_semantics<parallel>], iteration_bounds = array<i64: 1>, scalar_prefetch = 0 : i64, scratch_operands = 0 : i64, tpu.core_type = #tpu.core_type<tc>, window_params = [{transform_indices = @transform_0, window_bounds = array<i64: 8, 32>}, {pipeline_mode = #tpu.pipeline_mode<synchronous>, transform_indices = @transform_1, window_bounds = array<i64: 32, 256>}, {pipeline_mode = #tpu.pipeline_mode<synchronous>, transform_indices = @transform_2, window_bounds = array<i64: 1, 256>}, {transform_indices = @transform_3, window_bounds = array<i64: 8, 16>}, {transform_indices = @transform_4, window_bounds = array<i64: 8, 16>}]} {
    %c0 = arith.constant 0 : index
    %c0_0 = arith.constant 0 : index
    %0 = vector.load %arg1[%c0, %c0_0] : memref<8x32xf32, #tpu.memory_space<vmem>>, vector<8x32xf32>
    %c0_1 = arith.constant 0 : index
    %c0_2 = arith.constant 0 : index
    %1 = vector.load %arg2[%c0_1, %c0_2] : memref<32x256xf32, #tpu.memory_space<vmem>>, vector<32x256xf32>
    %cst = arith.constant dense<0.000000e+00> : vector<8x256xf32>
    %2 = tpu.matmul %0, %1, %cst {dimension_numbers = #tpu.dot_dimension_numbers<[1], [0], [0], [1], [0, 0, 1, 1], [], []>} : vector<8x32xf32>, vector<32x256xf32>, vector<8x256xf32> -> vector<8x256xf32>
    %c0_3 = arith.constant 0 : index
    %c0_4 = arith.constant 0 : index
    %3 = vector.load %arg3[%c0_3, %c0_4] : memref<1x256xf32, #tpu.memory_space<vmem>>, vector<1x256xf32>
    %4 = vector.broadcast %3 : vector<1x256xf32> to vector<8x256xf32>
    %5 = arith.addf %2, %4 : vector<8x256xf32>
    %6 = vector.extract_strided_slice %5 {offsets = [0, 0], sizes = [8, 16], strides = [1, 1]} : vector<8x256xf32> to vector<8x16xf32>
    %7 = arith.negf %6 : vector<8x16xf32>
    %8 = math.exp %7 : vector<8x16xf32>
    %cst_5 = arith.constant 1.000000e+00 : f32
    %9 = vector.broadcast %cst_5 : f32 to vector<8x16xf32>
    %10 = arith.addf %9, %8 : vector<8x16xf32>
    %11 = arith.divf %9, %10 : vector<8x16xf32>
    %c0_6 = arith.constant 0 : index
    %c0_7 = arith.constant 0 : index
    %12 = vector.load %arg4[%c0_6, %c0_7] : memref<8x16xf32, #tpu.memory_space<vmem>>, vector<8x16xf32>
    tpu.vector_store %arg4[%c0_6, %c0_7], %11 {strides = array<i32>} : memref<8x16xf32, #tpu.memory_space<vmem>>, vector<8x16xf32>,
    %13 = vector.extract_strided_slice %5 {offsets = [0, 128], sizes = [8, 16], strides = [1, 1]} : vector<8x256xf32> to vector<8x16xf32>
    %c0_8 = arith.constant 0 : index
    %c0_9 = arith.constant 0 : index
    %14 = vector.load %arg5[%c0_8, %c0_9] : memref<8x16xf32, #tpu.memory_space<vmem>>, vector<8x16xf32>
    tpu.vector_store %arg5[%c0_8, %c0_9], %13 {strides = array<i32>} : memref<8x16xf32, #tpu.memory_space<vmem>>, vector<8x16xf32>,
    return
  }
  func.func @transform_0(%arg0: i32) -> (i32, i32) {
    %c0_i32 = arith.constant 0 : i32
    %c0_i32_0 = arith.constant 0 : i32
    return %arg0, %c0_i32 : i32, i32
  }
  func.func @transform_1(%arg0: i32) -> (i32, i32) {
    %c0_i32 = arith.constant 0 : i32
    %c0_i32_0 = arith.constant 0 : i32
    %c0_i32_1 = arith.constant 0 : i32
    return %c0_i32, %c0_i32_0 : i32, i32
  }
  func.func @transform_2(%arg0: i32) -> (i32, i32) {
    %c0_i32 = arith.constant 0 : i32
    %c0_i32_0 = arith.constant 0 : i32
    %c0_i32_1 = arith.constant 0 : i32
    return %c0_i32, %c0_i32_0 : i32, i32
  }
  func.func @transform_3(%arg0: i32) -> (i32, i32) {
    %c0_i32 = arith.constant 0 : i32
    %c0_i32_0 = arith.constant 0 : i32
    return %arg0, %c0_i32 : i32, i32
  }
  func.func @transform_4(%arg0: i32) -> (i32, i32) {
    %c0_i32 = arith.constant 0 : i32
    %c0_i32_0 = arith.constant 0 : i32
    return %arg0, %c0_i32 : i32, i32
  }
}

</mosaic_0001>

<bundles_post_ra>
// kernel: tpu_custom_call.1
= control target key start
LH: loop header
LB: loop body
LE: loop exit
PB: predicated region body
PF: predicated region fallthrough
CT: control target
= control target key end

     0   :  { %10 = vsyncpa [#allocation3], 0  ;;  %s388_s0 = inlined_call_operand.hbm [shape: f32[8,32], index: 0, kind: input, shape index: {}]   ;;  %s389_s1 = inlined_call_operand.hbm [shape: f32[32,256], index: 1, kind: input, shape index: {}]   ;;  %s390_s2 = inlined_call_operand.vmem [shape: f32[1,256], index: 2, kind: input, shape index: {}]   ;;  %s391_s3 = inlined_call_operand.hbm [shape: f32[8,16], index: 3, kind: output, shape index: {0}]   ;;  %s392_s4 = inlined_call_operand.hbm [shape: f32[8,16], index: 4, kind: output, shape index: {1}]  }
   0x1   :  { %11 = vsyncpa [#allocation6], 0 }
   0x2   :  { %12 = vsyncpa [#allocation4], 0 }
   0x3   :  { %13 = vsyncpa [#allocation9], 0  ;;  %s296_s15 = smov [#allocation2]   ;;  %s297_s17 = smov [#allocation5]  }
   0x4   :  { %s20_s16 = sshll.u32 %s296_s15, 4  ;;  %s29_s18 = sshll.u32 %s297_s17, 4  ;;  %s21_s16 = int_to_ptr.vmem [resolvable:$true] %s20_s16  ;;  %s328_s18 = int_to_ptr.vmem [resolvable:$true] %s29_s18 }
   0x5   :  { %s200_s21 = scalar_lea.hbm %s388_s0, 128 }
   0x6   :  { %p201_p0 = scmp.ne.s32.totalorder %s388_s0, %s200_s21  ;;  %p204_p1 = scmp.lt.u32.totalorder %s200_s21, %s388_s0 }
   0x8   :  { %p206_p2 = pnand %p204_p1, %p201_p0 }
   0xa   :  { %209 = shalt.err (!%p206_p2)
}
   0xb   :  { %s210_s26 = scalar_lea.vmem %s21_s16, 128  ;;  %p215_p4 = scmp.lt.s32.totalorder %s21_s16, %s21_s16 }
   0xc   :  { %p211_p3 = scmp.ne.s32.totalorder %s21_s16, %s210_s26  ;;  %p216_p5 = scmp.lt.s32.totalorder %s210_s26, %s210_s26 }
   0xe   :  { %p217_p6 = por %p216_p5, %p215_p4 }
  0x10   :  { %p218_p7 = pnand %p217_p6, %p211_p3 }
  0x12   :  { %221 = shalt.err (!%p218_p7)
}
  0x13   :  { %23 = dma.hbm_to_vmem [thread:$0]  %s388_s0, 128, %s21_s16, [#allocation3]  }
  0x14   :  { %s222_s5 = scalar_lea.hbm %s389_s1, 1024 }
  0x15   :  { %p223_p8 = scmp.ne.s32.totalorder %s389_s1, %s222_s5  ;;  %p226_p9 = scmp.lt.u32.totalorder %s222_s5, %s389_s1 }
  0x17   :  { %p228_p10 = pnand %p226_p9, %p223_p8 }
  0x19   :  { %231 = shalt.err (!%p228_p10)
}
  0x1a   :  { %s232_s10 = scalar_lea.vmem %s328_s18, 1024  ;;  %p237_p12 = scmp.lt.s32.totalorder %s328_s18, %s328_s18 }
  0x1b   :  { %p233_p11 = scmp.ne.s32.totalorder %s328_s18, %s232_s10  ;;  %p238_p13 = scmp.lt.s32.totalorder %s232_s10, %s232_s10 }
  0x1d   :  { %p239_p0 = por %p238_p13, %p237_p12 }
  0x1f   :  { %p240_p1 = pnand %p239_p0, %p233_p11 }
  0x21   :  { %243 = shalt.err (!%p240_p1)
}
  0x22   :  { %s298_s0 = smov 256   ;;  %s299_s11 = smov 16  }
  0x23   :  { %35 = dma.hbm_to_vmem [thread:$0]  %s389_s1, 1024, %s328_s18, [#allocation6], %s298_s0, %s298_s0, %s299_s11  }
  0x24   :  { %288 = dma.done.wait [#allocation3], 128  }
  0x25   :  { %289 = vsyncadd [#allocation3], 4294967168 }
  0x26   :  { %290 = dma.done.wait [#allocation6], 1024  }
  0x27   :  { %291 = vsyncadd [#allocation6], 4294966272  ;;  %v300_v0 = vmov 0.0   ;;  %v46_v1 = vld [vmem:[#allocation5 + $0x8] sm:$0xff]  ;;  %v48_v2 = vld [vmem:[#allocation5 + $0x18] sm:$0xff]  ;;  %vm65_vm0 = vcmask 261120   ;;  %v55_v14 = vlaneseq }
  0x28   :  { %133 = vmatprep.mubr.f32.mxu0 %v300_v0  ;;  %v45_v3 = vld [vmem:[#allocation5] sm:$0xff]  ;;  %v181_v4 = vpack.c.bf16 %v48_v2, %v46_v1  ;;  %v47_v5 = vld [vmem:[#allocation5 + $0x10] sm:$0xff]  ;;  %v50_v6 = vld [vmem:[#allocation5 + $0x28] sm:$0xff]  ;;  %s301_s15 = smov [#allocation8]   ;;  %vm146_vm1 = vcmask 130048  }
  0x29   :  { %v52_v7 = vld [vmem:[#allocation5 + $0x38] sm:$0xff]  ;;  %v183_v8 = vpack.c.bf16 %v47_v5, %v45_v3  ;;  %v49_v10 = vld [vmem:[#allocation5 + $0x20] sm:$0xff]  ;;  %v51_v11 = vld [vmem:[#allocation5 + $0x30] sm:$0xff]  ;;  %v56_v15 = vshrl.u32 %v55_v14, 7  ;;  %s165_s16 = sshll.u32 %s301_s15, 4  ;;  %s166_s16 = int_to_ptr.vmem [resolvable:$true] %s165_s16 }
  0x2a   :  { %v185_v9 = vpack.c.bf16 %v52_v7, %v50_v6  ;;  %182 = vmatprep.subr.bf16.mxu0 %v181_v4  ;;  %v187_v12 = vpack.c.bf16 %v51_v11, %v49_v10  ;;  %v44_v13 = vld [vmem:[#allocation2] sm:$0xff]  ;;  %s244_s17 = scalar_lea.vmem %s166_s16, 128  ;;  %p249_p3 = scmp.lt.s32.totalorder %s166_s16, %s166_s16 }
  0x2b   :  { %184 = vmatpush1.bf16.msra.mxu0 %v183_v8  ;;  %v57_v16 = vsub.s32 0, %v56_v15  ;;  %v53_v17 = vld [vmem:[%s390_s2] sm:$0x3]  ;;  %v61_v18 = vsub.s32 1, %v56_v15  ;;  %p245_p2 = scmp.ne.s32.totalorder %s166_s16, %s244_s17  ;;  %p250_p4 = scmp.lt.s32.totalorder %s244_s17, %s244_s17 }
  0x2c   :  { %186 = vmatprep.subr.bf16.mxu0 %v185_v9 }
  0x2d   :  { %v58_v19 = vrot.slane %v53_v17, %v57_v16  ;;  %v62_v20 = vrot.slane %v53_v17, %v61_v18  ;;  %p251_p5 = por %p250_p4, %p249_p3 }
  0x2f   :  { %188 = vmatpush1.bf16.msra.mxu0 %v187_v12  ;;  %p252_p6 = pnand %p251_p5, %p245_p2 }
  0x32   :  { %179 = vmatmul.mubr.msk.f32.vlgmr.msra.gmra.mrb[0].mxu0 %vm65_vm0, %v44_v13 }
 0x105   :  { %v135_v21 = vpop.f32.mrb[0].mxu0 }
 0x106   :  { %v136_v22 = vadd.f32 %v135_v21, %v58_v19  ;;  %v137_v23 = vpop.f32.mrb[1].mxu0 }
 0x107   :  { %v138_v24 = vadd.f32 %v137_v23, %v62_v20 }
 0x108   :  { %v180_v25 = vmul.f32 -1.442695, %v136_v22 }
 0x109   :  { %148 = vst.msk [vmem:[#allocation8] sm:$0xff] %vm146_vm1, %v138_v24 }
 0x10a   :  { %196 = vpow2.f32 %v180_v25 }
 0x10b   :  { %255 = shalt.err (!%p252_p6)
}
 0x10c   :  { %s256_s19 = scalar_lea.hbm %s392_s4, 128 }
 0x10d   :  { %p257_p7 = scmp.ne.s32.totalorder %s392_s4, %s256_s19  ;;  %p260_p8 = scmp.lt.u32.totalorder %s256_s19, %s392_s4 }
 0x10f   :  { %p262_p9 = pnand %p260_p8, %p257_p7 }
 0x111   :  { %265 = shalt.err (!%p262_p9)
}
 0x112   :  { %168 = dma.vmem_to_hbm [thread:$0]  %s166_s16, 128, %s392_s4, [#allocation9]  }
 0x113   :  { %s302_s26 = smov [#allocation7]  }
 0x114   :  { %v197_v26 = vpop.eup %196  ;;  %s155_s27 = sshll.u32 %s302_s26, 4  ;;  %s156_s27 = int_to_ptr.vmem [resolvable:$true] %s155_s27 }
 0x115   :  { %v143_v27 = vadd.f32 1.0, %v197_v26  ;;  %s266_s28 = scalar_lea.vmem %s156_s27, 128  ;;  %p271_p11 = scmp.lt.s32.totalorder %s156_s27, %s156_s27 }
 0x116   :  { %p267_p10 = scmp.ne.s32.totalorder %s156_s27, %s266_s28  ;;  %p272_p12 = scmp.lt.s32.totalorder %s266_s28, %s266_s28 }
 0x117   :  { %198 = vrcp.f32 %v143_v27 }
 0x118   :  { %p273_p13 = por %p272_p12, %p271_p11 }
 0x11a   :  { %p274_p0 = pnand %p273_p13, %p267_p10 }
 0x121   :  { %v199_v28 = vpop.eup %198 }
 0x122   :  { %147 = vst.msk [vmem:[#allocation7] sm:$0xff] %vm146_vm1, %v199_v28 }
 0x123   :  { %277 = shalt.err (!%p274_p0)
}
 0x124   :  { %s278_s4 = scalar_lea.hbm %s391_s3, 128 }
 0x125   :  { %p279_p1 = scmp.ne.s32.totalorder %s391_s3, %s278_s4  ;;  %p282_p2 = scmp.lt.u32.totalorder %s278_s4, %s391_s3 }
 0x127   :  { %p284_p3 = pnand %p282_p2, %p279_p1 }
 0x129   :  { %287 = shalt.err (!%p284_p3)
}
 0x12a   :  { %158 = dma.vmem_to_hbm [thread:$0]  %s156_s27, 128, %s391_s3, [#allocation4]  }
 0x12b   :  { %292 = dma.done.wait [#allocation4], 128  }
 0x12c   :  { %293 = vsyncadd [#allocation4], 4294967168 }
 0x12d   :  { %294 = dma.done.wait [#allocation9], 128  }
 0x12e   :  { %295 = vsyncadd [#allocation9], 4294967168 }
 0x12f   :  { %175 = vsyncpa [#allocation3], 1 }
 0x130   :  { %176 = vsyncpa [#allocation6], 1 }
 0x131   :  { %177 = vsyncpa [#allocation4], 1 }
 0x132   :  { %178 = vsyncpa [#allocation9], 1 }

</bundles_post_ra>
